<compile_context>
chip_gen: v6e
topology: v6e:2x2x1
jax: 0.10.0
libtpu: 0.0.40
codegen_flags: <defaults>
</compile_context>

<pallas_src>
import functools

import jax
import jax.numpy as jnp
import numpy as np
from jax.experimental import pallas as pl
from jax.experimental.pallas import tpu as pltpu


# ----------------------------- Pallas kernel --------------------------------


def _bilstm_fused_kernel(gx_ref, whh_ref, wtag_ref, btag_ref, out_ref,
                         h_ref, *, S, Bp, H):
    """Fused bidirectional LSTM recurrence + hidden2tag.

    gx_ref   : (S*Bp, 8H)  precomputed input projections, time-major rows,
                           gate-major lanes [i_f,i_b,f_f,f_b,g_f,g_b,o_f,o_b];
                           fwd lanes use token at time j, bwd lanes token S-1-j.
    whh_ref  : (2H, 8H)    gate-major block recurrent weight (both directions).
    wtag_ref : (2H, Tpad)  hidden2tag weight (rows 0:H fwd, H:2H bwd), lane-padded.
    btag_ref : (1, Tpad)
    out_ref  : (S*Bp, Tpad) tag_space, time-major rows.
    h_ref    : (S*Bp, 2H)  VMEM scratch: [h_fwd | h_bwd] per time step.
    """
    # Cell-gate lanes get tanh, the rest get sigmoid (PyTorch order i,f,g,o ->
    # gate-major blocks [i,i,f,f,g,g,o,o], each H wide; g occupies 4H:6H).
    lane = jax.lax.broadcasted_iota(jnp.int32, (Bp, 8 * H), 1)
    is_g = jnp.logical_and(lane >= 4 * H, lane < 6 * H)

    zeros = jnp.zeros((Bp, 2 * H), jnp.float32)

    def step(j, carry):
        h, c = carry                                    # (Bp, 2H) = [fwd | bwd]
        rf = pl.multiple_of(j * Bp, Bp)                 # fwd output row (time j)
        rb = pl.multiple_of((S - 1 - j) * Bp, Bp)       # bwd output row (time S-1-j)

        # Single 256-lane MXU dispatch covers both directions' recurrence.
        gates = (gx_ref[pl.ds(rf, Bp), :]
                 + jnp.dot(h, whh_ref[...], preferred_element_type=jnp.float32))

        # Whole-vreg activations; lane mask selects tanh for the cell gate.
        act = jnp.where(is_g, jnp.tanh(gates), jax.nn.sigmoid(gates))
        i_g = act[:, :2 * H]
        f_g = act[:, 2 * H:4 * H]
        g_g = act[:, 4 * H:6 * H]
        o_g = act[:, 6 * H:]

        c_new = f_g * c + i_g * g_g
        h_new = o_g * jnp.tanh(c_new)

        # Stash hidden states for the fused epilogue (off the critical path).
        h_ref[pl.ds(rf, Bp), pl.ds(0, H)] = h_new[:, :H]
        h_ref[pl.ds(rb, Bp), pl.ds(H, H)] = h_new[:, H:]
        return h_new, c_new

    unroll = True if S <= 32 else 8
    jax.lax.fori_loop(0, S, step, (zeros, zeros), unroll=unroll)

    # Epilogue: one K=2H matmul over the resident hidden states.
    out_ref[...] = (jnp.dot(h_ref[...], wtag_ref[...],
                            preferred_element_type=jnp.float32)
                    + btag_ref[...])


# ----------------------------- wrappers --------------------------------------


def prepare_params(params, hidden_dim, num_tags):
    """One-time weight packing: fold input projection into the embedding,
    build the gate-major fused recurrent weight, pack hidden2tag."""
    H = hidden_dim
    T = num_tags
    Tp = ((T + 127) // 128) * 128
    emb = params["emb"].astype(jnp.float32)

    # Input projection folded into the embedding table (per direction),
    # gate order [i, f, g, o]:  gx[v] = emb[v] @ W_ih^T + (b_ih + b_hh).
    def gx_table(w_ih, b_ih, b_hh):
        return (emb @ jnp.transpose(w_ih).astype(jnp.float32)
                + (b_ih + b_hh).astype(jnp.float32)[None, :])

    gxf = gx_table(params["w_ih_f"], params["b_ih_f"], params["b_hh_f"])  # (V,4H)
    gxb = gx_table(params["w_ih_b"], params["b_ih_b"], params["b_hh_b"])  # (V,4H)

    # Gate-major fused recurrent weight (2H, 8H):
    # columns [i_f | i_b | f_f | f_b | g_f | g_b | o_f | o_b], each H wide;
    # rows 0:H = h_fwd contribution, rows H:2H = h_bwd contribution.
    whh_f_t = jnp.transpose(params["w_hh_f"]).astype(jnp.float32)  # (H, 4H)
    whh_b_t = jnp.transpose(params["w_hh_b"]).astype(jnp.float32)  # (H, 4H)
    zblk = jnp.zeros((H, 4, H), jnp.float32)
    top = jnp.stack([whh_f_t.reshape(H, 4, H), zblk], axis=2).reshape(H, 8 * H)
    bot = jnp.stack([zblk, whh_b_t.reshape(H, 4, H)], axis=2).reshape(H, 8 * H)
    whh_blk = jnp.concatenate([top, bot], axis=0)                  # (2H, 8H)

    # hidden2tag, lane-padded to a dense 128-wide output.
    wtag_t = jnp.transpose(params["w_tag"]).astype(jnp.float32)    # (2H, T)
    wtag = jnp.zeros((2 * H, Tp), jnp.float32).at[:, :T].set(wtag_t)
    btag = jnp.zeros((1, Tp), jnp.float32).at[0, :T].set(params["b_tag"])

    return {"gxf": gxf, "gxb": gxb, "whh_blk": whh_blk,
            "wtag": wtag, "btag": btag}


def bilstm_forward(prep, sentence, *, hidden_dim, num_tags):
    B, S = sentence.shape
    H = hidden_dim
    Bp = ((B + 7) // 8) * 8            # pad batch to full sublanes
    Tp = prep["wtag"].shape[1]

    # Embedding + input projection as one gather on the folded tables
    # (data-dependent gather kept as JAX glue).
    gxf = jnp.take(prep["gxf"], sentence, axis=0)        # (B, S, 4H)
    gxb = jnp.take(prep["gxb"], sentence, axis=0)        # (B, S, 4H)
    # nn.Dropout in eval mode is identity.
    # TODO(synk): training-mode dropout (random mask on embeddings) not implemented.
    gxb = gxb[:, ::-1, :]                                # bwd consumes reversed time
    # Interleave per gate -> [i_f,i_b,f_f,f_b,g_f,g_b,o_f,o_b] (B, S, 8H).
    gx = jnp.stack([gxf.reshape(B, S, 4, H),
                    gxb.reshape(B, S, 4, H)], axis=3).reshape(B, S, 8 * H)
    gx = jnp.transpose(gx, (1, 0, 2))                    # (S, B, 8H) time-major
    gx = jnp.pad(gx, ((0, 0), (0, Bp - B), (0, 0)))      # (S, Bp, 8H)
    gx2d = gx.reshape(S * Bp, 8 * H).astype(jnp.float32)

    kernel = functools.partial(_bilstm_fused_kernel, S=S, Bp=Bp, H=H)
    out = pl.pallas_call(
        kernel,
        out_shape=jax.ShapeDtypeStruct((S * Bp, Tp), jnp.float32),
        scratch_shapes=[
            pltpu.VMEM((S * Bp, 2 * H), jnp.float32),    # [h_fwd | h_bwd] states
        ],
    )(gx2d, prep["whh_blk"], prep["wtag"], prep["btag"])

    # (S*Bp, Tp) time-major -> (B*S, num_tags) batch-major (module layout).
    tags = out.reshape(S, Bp, Tp)[:, :B, :num_tags]      # (S, B, T)
    return jnp.transpose(tags, (1, 0, 2)).reshape(B * S, num_tags)


# ----------------------------- reference (pure JAX) --------------------------


def _lstm_dir_ref(x_tm, w_ih, w_hh, b_ih, b_hh, reverse):
    def step(carry, x_t):
        h, c = carry
        gates = x_t @ w_ih.T + b_ih + h @ w_hh.T + b_hh
        i_g, f_g, g_g, o_g = jnp.split(gates, 4, axis=1)
        i_g = jax.nn.sigmoid(i_g)
        f_g = jax.nn.sigmoid(f_g)
        g_g = jnp.tanh(g_g)
        o_g = jax.nn.sigmoid(o_g)
        c = f_g * c + i_g * g_g
        h = o_g * jnp.tanh(c)
        return (h, c), h

    S, B, _ = x_tm.shape
    H = w_hh.shape[1]
    init = (jnp.zeros((B, H), jnp.float32), jnp.zeros((B, H), jnp.float32))
    xs = x_tm[::-1] if reverse else x_tm
    _, hs = jax.lax.scan(step, init, xs)
    return hs[::-1] if reverse else hs


def bilstm_ref(params, sentence, hidden_dim):
    B, S = sentence.shape
    x = jnp.take(params["emb"], sentence, axis=0)
    x_tm = jnp.transpose(x, (1, 0, 2))
    h_f = _lstm_dir_ref(x_tm, params["w_ih_f"], params["w_hh_f"],
                        params["b_ih_f"], params["b_hh_f"], False)
    h_b = _lstm_dir_ref(x_tm, params["w_ih_b"], params["w_hh_b"],
                        params["b_ih_b"], params["b_hh_b"], True)
    out = jnp.concatenate([h_f, h_b], axis=-1)
    out = jnp.transpose(out, (1, 0, 2)).reshape(B * S, 2 * hidden_dim)
    return out @ params["w_tag"].T + params["b_tag"]


# ----------------------------- main ------------------------------------------


if __name__ == "__main__":
    # Small shapes consistent with the module's forward.
    B, S = 2, 8
    vocab_size = 50
    num_tags = 8
    E = 32    # embedding_dim
    H = 32    # hidden_dim

    key = jax.random.PRNGKey(0)
    keys = jax.random.split(key, 12)

    stdv = 1.0 / np.sqrt(H)
    u = lambda k, shape, s: jax.random.uniform(k, shape, jnp.float32, -s, s)

    emb = jax.random.normal(keys[0], (vocab_size + 1, E), jnp.float32)
    emb = emb.at[num_tags].set(0.0)   # padding_idx=num_tags

    params = {
        "emb": emb,
        # forward-direction LSTM weights (PyTorch layout: (4H, E)/(4H, H))
        "w_ih_f": u(keys[1], (4 * H, E), stdv),
        "w_hh_f": u(keys[2], (4 * H, H), stdv),
        "b_ih_f": u(keys[3], (4 * H,), stdv),
        "b_hh_f": u(keys[4], (4 * H,), stdv),
        # backward-direction LSTM weights
        "w_ih_b": u(keys[5], (4 * H, E), stdv),
        "w_hh_b": u(keys[6], (4 * H, H), stdv),
        "b_ih_b": u(keys[7], (4 * H,), stdv),
        "b_hh_b": u(keys[8], (4 * H,), stdv),
        # hidden2tag
        "w_tag": u(keys[9], (num_tags, 2 * H), 1.0 / np.sqrt(2 * H)),
        "b_tag": u(keys[10], (num_tags,), 1.0 / np.sqrt(2 * H)),
    }

    sentence = jax.random.randint(keys[11], (B, S), 0, vocab_size + 1,
                                  dtype=jnp.int32)

    # Weight packing / input-projection folding done ONCE (not per forward).
    prep = prepare_params(params, H, num_tags)

    fwd = jax.jit(functools.partial(bilstm_forward,
                                    hidden_dim=H, num_tags=num_tags))
    tag_space = jax.block_until_ready(fwd(prep, sentence))
    ref = jax.block_until_ready(bilstm_ref(params, sentence, H))

    assert tag_space.shape == (B * S, num_tags), tag_space.shape
    np.testing.assert_allclose(np.asarray(tag_space), np.asarray(ref),
                               rtol=1e-5, atol=1e-5)
    print("KERNEL_OK")
</pallas_src>

<mosaic_0001>
module attributes {stable_mosaic.version = 11 : i64} {
  func.func @_bilstm_fused_kernel(%arg0: memref<64x256xf32, #tpu.memory_space<vmem>>, %arg1: memref<64x256xf32, #tpu.memory_space<vmem>>, %arg2: memref<64x128xf32, #tpu.memory_space<vmem>>, %arg3: memref<1x128xf32, #tpu.memory_space<vmem>>, %arg4: memref<64x128xf32, #tpu.memory_space<vmem>>, %arg5: memref<64x64xf32, #tpu.memory_space<vmem>>) attributes {dimension_semantics = [], scalar_prefetch = 0 : i64, scratch_operands = 1 : i64, tpu.core_type = #tpu.core_type<tc>} {
    %0 = tpu.iota {dimensions = array<i32: 1>} : vector<8x256xi32>
    %c128_i32 = arith.constant 128 : i32
    %1 = vector.broadcast %c128_i32 : i32 to vector<8x256xi32>
    %2 = arith.cmpi sge, %0, %1 : vector<8x256xi32>
    %c192_i32 = arith.constant 192 : i32
    %3 = vector.broadcast %c192_i32 : i32 to vector<8x256xi32>
    %4 = arith.cmpi slt, %0, %3 : vector<8x256xi32>
    %5 = arith.andi %2, %4 : vector<8x256xi1>
    %cst = arith.constant 0.000000e+00 : f32
    %6 = vector.broadcast %cst : f32 to vector<8x64xf32>
    %c0_i32 = arith.constant 0 : i32
    %c8_i32 = arith.constant 8 : i32
    %7 = arith.muli %c0_i32, %c8_i32 : i32
    %8 = tpu.assume_multiple %7, 8 : i32
    %c7_i32 = arith.constant 7 : i32
    %9 = arith.subi %c7_i32, %c0_i32 : i32
    %c8_i32_0 = arith.constant 8 : i32
    %10 = arith.muli %9, %c8_i32_0 : i32
    %11 = tpu.assume_multiple %10, 8 : i32
    %12 = arith.index_cast %8 : i32 to index
    %c0 = arith.constant 0 : index
    %13 = vector.load %arg0[%12, %c0] : memref<64x256xf32, #tpu.memory_space<vmem>>, vector<8x256xf32>
    %c0_1 = arith.constant 0 : index
    %c0_2 = arith.constant 0 : index
    %14 = vector.load %arg1[%c0_1, %c0_2] : memref<64x256xf32, #tpu.memory_space<vmem>>, vector<64x256xf32>
    %cst_3 = arith.constant dense<0.000000e+00> : vector<8x256xf32>
    %15 = tpu.matmul %6, %14, %cst_3 {dimension_numbers = #tpu.dot_dimension_numbers<[1], [0], [0], [1], [0, 0, 1, 1], [], []>} : vector<8x64xf32>, vector<64x256xf32>, vector<8x256xf32> -> vector<8x256xf32>
    %16 = arith.addf %13, %15 : vector<8x256xf32>
    %17 = math.tanh %16 : vector<8x256xf32>
    %18 = arith.negf %16 : vector<8x256xf32>
    %19 = math.exp %18 : vector<8x256xf32>
    %cst_4 = arith.constant 1.000000e+00 : f32
    %20 = vector.broadcast %cst_4 : f32 to vector<8x256xf32>
    %21 = arith.addf %20, %19 : vector<8x256xf32>
    %22 = arith.divf %20, %21 : vector<8x256xf32>
    %23 = arith.select %5, %17, %22 : vector<8x256xi1>, vector<8x256xf32>
    %24 = vector.extract_strided_slice %23 {offsets = [0, 0], sizes = [8, 64], strides = [1, 1]} : vector<8x256xf32> to vector<8x64xf32>
    %25 = vector.extract_strided_slice %23 {offsets = [0, 64], sizes = [8, 64], strides = [1, 1]} : vector<8x256xf32> to vector<8x64xf32>
    %26 = vector.extract_strided_slice %23 {offsets = [0, 128], sizes = [8, 64], strides = [1, 1]} : vector<8x256xf32> to vector<8x64xf32>
    %27 = vector.extract_strided_slice %23 {offsets = [0, 192], sizes = [8, 64], strides = [1, 1]} : vector<8x256xf32> to vector<8x64xf32>
    %28 = arith.mulf %25, %6 : vector<8x64xf32>
    %29 = arith.mulf %24, %26 : vector<8x64xf32>
    %30 = arith.addf %28, %29 : vector<8x64xf32>
    %31 = math.tanh %30 : vector<8x64xf32>
    %32 = arith.mulf %27, %31 : vector<8x64xf32>
    %33 = vector.extract_strided_slice %32 {offsets = [0, 0], sizes = [8, 32], strides = [1, 1]} : vector<8x64xf32> to vector<8x32xf32>
    %34 = arith.index_cast %8 : i32 to index
    %c0_5 = arith.constant 0 : index
    %35 = vector.load %arg5[%34, %c0_5] : memref<64x64xf32, #tpu.memory_space<vmem>>, vector<8x32xf32>
    tpu.vector_store %arg5[%34, %c0_5], %33 {strides = array<i32>} : memref<64x64xf32, #tpu.memory_space<vmem>>, vector<8x32xf32>,
    %36 = vector.extract_strided_slice %32 {offsets = [0, 32], sizes = [8, 32], strides = [1, 1]} : vector<8x64xf32> to vector<8x32xf32>
    %37 = arith.index_cast %11 : i32 to index
    %c32 = arith.constant 32 : index
    %38 = vector.load %arg5[%37, %c32] : memref<64x64xf32, #tpu.memory_space<vmem>>, vector<8x32xf32>
    tpu.vector_store %arg5[%37, %c32], %36 {strides = array<i32>} : memref<64x64xf32, #tpu.memory_space<vmem>>, vector<8x32xf32>,
    %c1_i32 = arith.constant 1 : i32
    %c8_i32_6 = arith.constant 8 : i32
    %39 = arith.muli %c1_i32, %c8_i32_6 : i32
    %40 = tpu.assume_multiple %39, 8 : i32
    %c7_i32_7 = arith.constant 7 : i32
    %41 = arith.subi %c7_i32_7, %c1_i32 : i32
    %c8_i32_8 = arith.constant 8 : i32
    %42 = arith.muli %41, %c8_i32_8 : i32
    %43 = tpu.assume_multiple %42, 8 : i32
    %44 = arith.index_cast %40 : i32 to index
    %c0_9 = arith.constant 0 : index
    %45 = vector.load %arg0[%44, %c0_9] : memref<64x256xf32, #tpu.memory_space<vmem>>, vector<8x256xf32>
    %c0_10 = arith.constant 0 : index
    %c0_11 = arith.constant 0 : index
    %46 = vector.load %arg1[%c0_10, %c0_11] : memref<64x256xf32, #tpu.memory_space<vmem>>, vector<64x256xf32>
    %cst_12 = arith.constant dense<0.000000e+00> : vector<8x256xf32>
    %47 = tpu.matmul %32, %46, %cst_12 {dimension_numbers = #tpu.dot_dimension_numbers<[1], [0], [0], [1], [0, 0, 1, 1], [], []>} : vector<8x64xf32>, vector<64x256xf32>, vector<8x256xf32> -> vector<8x256xf32>
    %48 = arith.addf %45, %47 : vector<8x256xf32>
    %49 = math.tanh %48 : vector<8x256xf32>
    %50 = arith.negf %48 : vector<8x256xf32>
    %51 = math.exp %50 : vector<8x256xf32>
    %cst_13 = arith.constant 1.000000e+00 : f32
    %52 = vector.broadcast %cst_13 : f32 to vector<8x256xf32>
    %53 = arith.addf %52, %51 : vector<8x256xf32>
    %54 = arith.divf %52, %53 : vector<8x256xf32>
    %55 = arith.select %5, %49, %54 : vector<8x256xi1>, vector<8x256xf32>
    %56 = vector.extract_strided_slice %55 {offsets = [0, 0], sizes = [8, 64], strides = [1, 1]} : vector<8x256xf32> to vector<8x64xf32>
    %57 = vector.extract_strided_slice %55 {offsets = [0, 64], sizes = [8, 64], strides = [1, 1]} : vector<8x256xf32> to vector<8x64xf32>
    %58 = vector.extract_strided_slice %55 {offsets = [0, 128], sizes = [8, 64], strides = [1, 1]} : vector<8x256xf32> to vector<8x64xf32>
    %59 = vector.extract_strided_slice %55 {offsets = [0, 192], sizes = [8, 64], strides = [1, 1]} : vector<8x256xf32> to vector<8x64xf32>
    %60 = arith.mulf %57, %30 : vector<8x64xf32>
    %61 = arith.mulf %56, %58 : vector<8x64xf32>
    %62 = arith.addf %60, %61 : vector<8x64xf32>
    %63 = math.tanh %62 : vector<8x64xf32>
    %64 = arith.mulf %59, %63 : vector<8x64xf32>
    %65 = vector.extract_strided_slice %64 {offsets = [0, 0], sizes = [8, 32], strides = [1, 1]} : vector<8x64xf32> to vector<8x32xf32>
    %66 = arith.index_cast %40 : i32 to index
    %c0_14 = arith.constant 0 : index
    %67 = vector.load %arg5[%66, %c0_14] : memref<64x64xf32, #tpu.memory_space<vmem>>, vector<8x32xf32>
    tpu.vector_store %arg5[%66, %c0_14], %65 {strides = array<i32>} : memref<64x64xf32, #tpu.memory_space<vmem>>, vector<8x32xf32>,
    %68 = vector.extract_strided_slice %64 {offsets = [0, 32], sizes = [8, 32], strides = [1, 1]} : vector<8x64xf32> to vector<8x32xf32>
    %69 = arith.index_cast %43 : i32 to index
    %c32_15 = arith.constant 32 : index
    %70 = vector.load %arg5[%69, %c32_15] : memref<64x64xf32, #tpu.memory_space<vmem>>, vector<8x32xf32>
    tpu.vector_store %arg5[%69, %c32_15], %68 {strides = array<i32>} : memref<64x64xf32, #tpu.memory_space<vmem>>, vector<8x32xf32>,
    %c2_i32 = arith.constant 2 : i32
    %c8_i32_16 = arith.constant 8 : i32
    %71 = arith.muli %c2_i32, %c8_i32_16 : i32
    %72 = tpu.assume_multiple %71, 8 : i32
    %c7_i32_17 = arith.constant 7 : i32
    %73 = arith.subi %c7_i32_17, %c2_i32 : i32
    %c8_i32_18 = arith.constant 8 : i32
    %74 = arith.muli %73, %c8_i32_18 : i32
    %75 = tpu.assume_multiple %74, 8 : i32
    %76 = arith.index_cast %72 : i32 to index
    %c0_19 = arith.constant 0 : index
    %77 = vector.load %arg0[%76, %c0_19] : memref<64x256xf32, #tpu.memory_space<vmem>>, vector<8x256xf32>
    %c0_20 = arith.constant 0 : index
    %c0_21 = arith.constant 0 : index
    %78 = vector.load %arg1[%c0_20, %c0_21] : memref<64x256xf32, #tpu.memory_space<vmem>>, vector<64x256xf32>
    %cst_22 = arith.constant dense<0.000000e+00> : vector<8x256xf32>
    %79 = tpu.matmul %64, %78, %cst_22 {dimension_numbers = #tpu.dot_dimension_numbers<[1], [0], [0], [1], [0, 0, 1, 1], [], []>} : vector<8x64xf32>, vector<64x256xf32>, vector<8x256xf32> -> vector<8x256xf32>
    %80 = arith.addf %77, %79 : vector<8x256xf32>
    %81 = math.tanh %80 : vector<8x256xf32>
    %82 = arith.negf %80 : vector<8x256xf32>
    %83 = math.exp %82 : vector<8x256xf32>
    %cst_23 = arith.constant 1.000000e+00 : f32
    %84 = vector.broadcast %cst_23 : f32 to vector<8x256xf32>
    %85 = arith.addf %84, %83 : vector<8x256xf32>
    %86 = arith.divf %84, %85 : vector<8x256xf32>
    %87 = arith.select %5, %81, %86 : vector<8x256xi1>, vector<8x256xf32>
    %88 = vector.extract_strided_slice %87 {offsets = [0, 0], sizes = [8, 64], strides = [1, 1]} : vector<8x256xf32> to vector<8x64xf32>
    %89 = vector.extract_strided_slice %87 {offsets = [0, 64], sizes = [8, 64], strides = [1, 1]} : vector<8x256xf32> to vector<8x64xf32>
    %90 = vector.extract_strided_slice %87 {offsets = [0, 128], sizes = [8, 64], strides = [1, 1]} : vector<8x256xf32> to vector<8x64xf32>
    %91 = vector.extract_strided_slice %87 {offsets = [0, 192], sizes = [8, 64], strides = [1, 1]} : vector<8x256xf32> to vector<8x64xf32>
    %92 = arith.mulf %89, %62 : vector<8x64xf32>
    %93 = arith.mulf %88, %90 : vector<8x64xf32>
    %94 = arith.addf %92, %93 : vector<8x64xf32>
    %95 = math.tanh %94 : vector<8x64xf32>
    %96 = arith.mulf %91, %95 : vector<8x64xf32>
    %97 = vector.extract_strided_slice %96 {offsets = [0, 0], sizes = [8, 32], strides = [1, 1]} : vector<8x64xf32> to vector<8x32xf32>
    %98 = arith.index_cast %72 : i32 to index
    %c0_24 = arith.constant 0 : index
    %99 = vector.load %arg5[%98, %c0_24] : memref<64x64xf32, #tpu.memory_space<vmem>>, vector<8x32xf32>
    tpu.vector_store %arg5[%98, %c0_24], %97 {strides = array<i32>} : memref<64x64xf32, #tpu.memory_space<vmem>>, vector<8x32xf32>,
    %100 = vector.extract_strided_slice %96 {offsets = [0, 32], sizes = [8, 32], strides = [1, 1]} : vector<8x64xf32> to vector<8x32xf32>
    %101 = arith.index_cast %75 : i32 to index
    %c32_25 = arith.constant 32 : index
    %102 = vector.load %arg5[%101, %c32_25] : memref<64x64xf32, #tpu.memory_space<vmem>>, vector<8x32xf32>
    tpu.vector_store %arg5[%101, %c32_25], %100 {strides = array<i32>} : memref<64x64xf32, #tpu.memory_space<vmem>>, vector<8x32xf32>,
    %c3_i32 = arith.constant 3 : i32
    %c8_i32_26 = arith.constant 8 : i32
    %103 = arith.muli %c3_i32, %c8_i32_26 : i32
    %104 = tpu.assume_multiple %103, 8 : i32
    %c7_i32_27 = arith.constant 7 : i32
    %105 = arith.subi %c7_i32_27, %c3_i32 : i32
    %c8_i32_28 = arith.constant 8 : i32
    %106 = arith.muli %105, %c8_i32_28 : i32
    %107 = tpu.assume_multiple %106, 8 : i32
    %108 = arith.index_cast %104 : i32 to index
    %c0_29 = arith.constant 0 : index
    %109 = vector.load %arg0[%108, %c0_29] : memref<64x256xf32, #tpu.memory_space<vmem>>, vector<8x256xf32>
    %c0_30 = arith.constant 0 : index
    %c0_31 = arith.constant 0 : index
    %110 = vector.load %arg1[%c0_30, %c0_31] : memref<64x256xf32, #tpu.memory_space<vmem>>, vector<64x256xf32>
    %cst_32 = arith.constant dense<0.000000e+00> : vector<8x256xf32>
    %111 = tpu.matmul %96, %110, %cst_32 {dimension_numbers = #tpu.dot_dimension_numbers<[1], [0], [0], [1], [0, 0, 1, 1], [], []>} : vector<8x64xf32>, vector<64x256xf32>, vector<8x256xf32> -> vector<8x256xf32>
    %112 = arith.addf %109, %111 : vector<8x256xf32>
    %113 = math.tanh %112 : vector<8x256xf32>
    %114 = arith.negf %112 : vector<8x256xf32>
    %115 = math.exp %114 : vector<8x256xf32>
    %cst_33 = arith.constant 1.000000e+00 : f32
    %116 = vector.broadcast %cst_33 : f32 to vector<8x256xf32>
    %117 = arith.addf %116, %115 : vector<8x256xf32>
    %118 = arith.divf %116, %117 : vector<8x256xf32>
    %119 = arith.select %5, %113, %118 : vector<8x256xi1>, vector<8x256xf32>
    %120 = vector.extract_strided_slice %119 {offsets = [0, 0], sizes = [8, 64], strides = [1, 1]} : vector<8x256xf32> to vector<8x64xf32>
    %121 = vector.extract_strided_slice %119 {offsets = [0, 64], sizes = [8, 64], strides = [1, 1]} : vector<8x256xf32> to vector<8x64xf32>
    %122 = vector.extract_strided_slice %119 {offsets = [0, 128], sizes = [8, 64], strides = [1, 1]} : vector<8x256xf32> to vector<8x64xf32>
    %123 = vector.extract_strided_slice %119 {offsets = [0, 192], sizes = [8, 64], strides = [1, 1]} : vector<8x256xf32> to vector<8x64xf32>
    %124 = arith.mulf %121, %94 : vector<8x64xf32>
    %125 = arith.mulf %120, %122 : vector<8x64xf32>
    %126 = arith.addf %124, %125 : vector<8x64xf32>
    %127 = math.tanh %126 : vector<8x64xf32>
    %128 = arith.mulf %123, %127 : vector<8x64xf32>
    %129 = vector.extract_strided_slice %128 {offsets = [0, 0], sizes = [8, 32], strides = [1, 1]} : vector<8x64xf32> to vector<8x32xf32>
    %130 = arith.index_cast %104 : i32 to index
    %c0_34 = arith.constant 0 : index
    %131 = vector.load %arg5[%130, %c0_34] : memref<64x64xf32, #tpu.memory_space<vmem>>, vector<8x32xf32>
    tpu.vector_store %arg5[%130, %c0_34], %129 {strides = array<i32>} : memref<64x64xf32, #tpu.memory_space<vmem>>, vector<8x32xf32>,
    %132 = vector.extract_strided_slice %128 {offsets = [0, 32], sizes = [8, 32], strides = [1, 1]} : vector<8x64xf32> to vector<8x32xf32>
    %133 = arith.index_cast %107 : i32 to index
    %c32_35 = arith.constant 32 : index
    %134 = vector.load %arg5[%133, %c32_35] : memref<64x64xf32, #tpu.memory_space<vmem>>, vector<8x32xf32>
    tpu.vector_store %arg5[%133, %c32_35], %132 {strides = array<i32>} : memref<64x64xf32, #tpu.memory_space<vmem>>, vector<8x32xf32>,
    %c4_i32 = arith.constant 4 : i32
    %c8_i32_36 = arith.constant 8 : i32
    %135 = arith.muli %c4_i32, %c8_i32_36 : i32
    %136 = tpu.assume_multiple %135, 8 : i32
    %c7_i32_37 = arith.constant 7 : i32
    %137 = arith.subi %c7_i32_37, %c4_i32 : i32
    %c8_i32_38 = arith.constant 8 : i32
    %138 = arith.muli %137, %c8_i32_38 : i32
    %139 = tpu.assume_multiple %138, 8 : i32
    %140 = arith.index_cast %136 : i32 to index
    %c0_39 = arith.constant 0 : index
    %141 = vector.load %arg0[%140, %c0_39] : memref<64x256xf32, #tpu.memory_space<vmem>>, vector<8x256xf32>
    %c0_40 = arith.constant 0 : index
    %c0_41 = arith.constant 0 : index
    %142 = vector.load %arg1[%c0_40, %c0_41] : memref<64x256xf32, #tpu.memory_space<vmem>>, vector<64x256xf32>
    %cst_42 = arith.constant dense<0.000000e+00> : vector<8x256xf32>
    %143 = tpu.matmul %128, %142, %cst_42 {dimension_numbers = #tpu.dot_dimension_numbers<[1], [0], [0], [1], [0, 0, 1, 1], [], []>} : vector<8x64xf32>, vector<64x256xf32>, vector<8x256xf32> -> vector<8x256xf32>
    %144 = arith.addf %141, %143 : vector<8x256xf32>
    %145 = math.tanh %144 : vector<8x256xf32>
    %146 = arith.negf %144 : vector<8x256xf32>
    %147 = math.exp %146 : vector<8x256xf32>
    %cst_43 = arith.constant 1.000000e+00 : f32
    %148 = vector.broadcast %cst_43 : f32 to vector<8x256xf32>
    %149 = arith.addf %148, %147 : vector<8x256xf32>
    %150 = arith.divf %148, %149 : vector<8x256xf32>
    %151 = arith.select %5, %145, %150 : vector<8x256xi1>, vector<8x256xf32>
    %152 = vector.extract_strided_slice %151 {offsets = [0, 0], sizes = [8, 64], strides = [1, 1]} : vector<8x256xf32> to vector<8x64xf32>
    %153 = vector.extract_strided_slice %151 {offsets = [0, 64], sizes = [8, 64], strides = [1, 1]} : vector<8x256xf32> to vector<8x64xf32>
    %154 = vector.extract_strided_slice %151 {offsets = [0, 128], sizes = [8, 64], strides = [1, 1]} : vector<8x256xf32> to vector<8x64xf32>
    %155 = vector.extract_strided_slice %151 {offsets = [0, 192], sizes = [8, 64], strides = [1, 1]} : vector<8x256xf32> to vector<8x64xf32>
    %156 = arith.mulf %153, %126 : vector<8x64xf32>
    %157 = arith.mulf %152, %154 : vector<8x64xf32>
    %158 = arith.addf %156, %157 : vector<8x64xf32>
    %159 = math.tanh %158 : vector<8x64xf32>
    %160 = arith.mulf %155, %159 : vector<8x64xf32>
    %161 = vector.extract_strided_slice %160 {offsets = [0, 0], sizes = [8, 32], strides = [1, 1]} : vector<8x64xf32> to vector<8x32xf32>
    %162 = arith.index_cast %136 : i32 to index
    %c0_44 = arith.constant 0 : index
    %163 = vector.load %arg5[%162, %c0_44] : memref<64x64xf32, #tpu.memory_space<vmem>>, vector<8x32xf32>
    tpu.vector_store %arg5[%162, %c0_44], %161 {strides = array<i32>} : memref<64x64xf32, #tpu.memory_space<vmem>>, vector<8x32xf32>,
    %164 = vector.extract_strided_slice %160 {offsets = [0, 32], sizes = [8, 32], strides = [1, 1]} : vector<8x64xf32> to vector<8x32xf32>
    %165 = arith.index_cast %139 : i32 to index
    %c32_45 = arith.constant 32 : index
    %166 = vector.load %arg5[%165, %c32_45] : memref<64x64xf32, #tpu.memory_space<vmem>>, vector<8x32xf32>
    tpu.vector_store %arg5[%165, %c32_45], %164 {strides = array<i32>} : memref<64x64xf32, #tpu.memory_space<vmem>>, vector<8x32xf32>,
    %c5_i32 = arith.constant 5 : i32
    %c8_i32_46 = arith.constant 8 : i32
    %167 = arith.muli %c5_i32, %c8_i32_46 : i32
    %168 = tpu.assume_multiple %167, 8 : i32
    %c7_i32_47 = arith.constant 7 : i32
    %169 = arith.subi %c7_i32_47, %c5_i32 : i32
    %c8_i32_48 = arith.constant 8 : i32
    %170 = arith.muli %169, %c8_i32_48 : i32
    %171 = tpu.assume_multiple %170, 8 : i32
    %172 = arith.index_cast %168 : i32 to index
    %c0_49 = arith.constant 0 : index
    %173 = vector.load %arg0[%172, %c0_49] : memref<64x256xf32, #tpu.memory_space<vmem>>, vector<8x256xf32>
    %c0_50 = arith.constant 0 : index
    %c0_51 = arith.constant 0 : index
    %174 = vector.load %arg1[%c0_50, %c0_51] : memref<64x256xf32, #tpu.memory_space<vmem>>, vector<64x256xf32>
    %cst_52 = arith.constant dense<0.000000e+00> : vector<8x256xf32>
    %175 = tpu.matmul %160, %174, %cst_52 {dimension_numbers = #tpu.dot_dimension_numbers<[1], [0], [0], [1], [0, 0, 1, 1], [], []>} : vector<8x64xf32>, vector<64x256xf32>, vector<8x256xf32> -> vector<8x256xf32>
    %176 = arith.addf %173, %175 : vector<8x256xf32>
    %177 = math.tanh %176 : vector<8x256xf32>
    %178 = arith.negf %176 : vector<8x256xf32>
    %179 = math.exp %178 : vector<8x256xf32>
    %cst_53 = arith.constant 1.000000e+00 : f32
    %180 = vector.broadcast %cst_53 : f32 to vector<8x256xf32>
    %181 = arith.addf %180, %179 : vector<8x256xf32>
    %182 = arith.divf %180, %181 : vector<8x256xf32>
    %183 = arith.select %5, %177, %182 : vector<8x256xi1>, vector<8x256xf32>
    %184 = vector.extract_strided_slice %183 {offsets = [0, 0], sizes = [8, 64], strides = [1, 1]} : vector<8x256xf32> to vector<8x64xf32>
    %185 = vector.extract_strided_slice %183 {offsets = [0, 64], sizes = [8, 64], strides = [1, 1]} : vector<8x256xf32> to vector<8x64xf32>
    %186 = vector.extract_strided_slice %183 {offsets = [0, 128], sizes = [8, 64], strides = [1, 1]} : vector<8x256xf32> to vector<8x64xf32>
    %187 = vector.extract_strided_slice %183 {offsets = [0, 192], sizes = [8, 64], strides = [1, 1]} : vector<8x256xf32> to vector<8x64xf32>
    %188 = arith.mulf %185, %158 : vector<8x64xf32>
    %189 = arith.mulf %184, %186 : vector<8x64xf32>
    %190 = arith.addf %188, %189 : vector<8x64xf32>
    %191 = math.tanh %190 : vector<8x64xf32>
    %192 = arith.mulf %187, %191 : vector<8x64xf32>
    %193 = vector.extract_strided_slice %192 {offsets = [0, 0], sizes = [8, 32], strides = [1, 1]} : vector<8x64xf32> to vector<8x32xf32>
    %194 = arith.index_cast %168 : i32 to index
    %c0_54 = arith.constant 0 : index
    %195 = vector.load %arg5[%194, %c0_54] : memref<64x64xf32, #tpu.memory_space<vmem>>, vector<8x32xf32>
    tpu.vector_store %arg5[%194, %c0_54], %193 {strides = array<i32>} : memref<64x64xf32, #tpu.memory_space<vmem>>, vector<8x32xf32>,
    %196 = vector.extract_strided_slice %192 {offsets = [0, 32], sizes = [8, 32], strides = [1, 1]} : vector<8x64xf32> to vector<8x32xf32>
    %197 = arith.index_cast %171 : i32 to index
    %c32_55 = arith.constant 32 : index
    %198 = vector.load %arg5[%197, %c32_55] : memref<64x64xf32, #tpu.memory_space<vmem>>, vector<8x32xf32>
    tpu.vector_store %arg5[%197, %c32_55], %196 {strides = array<i32>} : memref<64x64xf32, #tpu.memory_space<vmem>>, vector<8x32xf32>,
    %c6_i32 = arith.constant 6 : i32
    %c8_i32_56 = arith.constant 8 : i32
    %199 = arith.muli %c6_i32, %c8_i32_56 : i32
    %200 = tpu.assume_multiple %199, 8 : i32
    %c7_i32_57 = arith.constant 7 : i32
    %201 = arith.subi %c7_i32_57, %c6_i32 : i32
    %c8_i32_58 = arith.constant 8 : i32
    %202 = arith.muli %201, %c8_i32_58 : i32
    %203 = tpu.assume_multiple %202, 8 : i32
    %204 = arith.index_cast %200 : i32 to index
    %c0_59 = arith.constant 0 : index
    %205 = vector.load %arg0[%204, %c0_59] : memref<64x256xf32, #tpu.memory_space<vmem>>, vector<8x256xf32>
    %c0_60 = arith.constant 0 : index
    %c0_61 = arith.constant 0 : index
    %206 = vector.load %arg1[%c0_60, %c0_61] : memref<64x256xf32, #tpu.memory_space<vmem>>, vector<64x256xf32>
    %cst_62 = arith.constant dense<0.000000e+00> : vector<8x256xf32>
    %207 = tpu.matmul %192, %206, %cst_62 {dimension_numbers = #tpu.dot_dimension_numbers<[1], [0], [0], [1], [0, 0, 1, 1], [], []>} : vector<8x64xf32>, vector<64x256xf32>, vector<8x256xf32> -> vector<8x256xf32>
    %208 = arith.addf %205, %207 : vector<8x256xf32>
    %209 = math.tanh %208 : vector<8x256xf32>
    %210 = arith.negf %208 : vector<8x256xf32>
    %211 = math.exp %210 : vector<8x256xf32>
    %cst_63 = arith.constant 1.000000e+00 : f32
    %212 = vector.broadcast %cst_63 : f32 to vector<8x256xf32>
    %213 = arith.addf %212, %211 : vector<8x256xf32>
    %214 = arith.divf %212, %213 : vector<8x256xf32>
    %215 = arith.select %5, %209, %214 : vector<8x256xi1>, vector<8x256xf32>
    %216 = vector.extract_strided_slice %215 {offsets = [0, 0], sizes = [8, 64], strides = [1, 1]} : vector<8x256xf32> to vector<8x64xf32>
    %217 = vector.extract_strided_slice %215 {offsets = [0, 64], sizes = [8, 64], strides = [1, 1]} : vector<8x256xf32> to vector<8x64xf32>
    %218 = vector.extract_strided_slice %215 {offsets = [0, 128], sizes = [8, 64], strides = [1, 1]} : vector<8x256xf32> to vector<8x64xf32>
    %219 = vector.extract_strided_slice %215 {offsets = [0, 192], sizes = [8, 64], strides = [1, 1]} : vector<8x256xf32> to vector<8x64xf32>
    %220 = arith.mulf %217, %190 : vector<8x64xf32>
    %221 = arith.mulf %216, %218 : vector<8x64xf32>
    %222 = arith.addf %220, %221 : vector<8x64xf32>
    %223 = math.tanh %222 : vector<8x64xf32>
    %224 = arith.mulf %219, %223 : vector<8x64xf32>
    %225 = vector.extract_strided_slice %224 {offsets = [0, 0], sizes = [8, 32], strides = [1, 1]} : vector<8x64xf32> to vector<8x32xf32>
    %226 = arith.index_cast %200 : i32 to index
    %c0_64 = arith.constant 0 : index
    %227 = vector.load %arg5[%226, %c0_64] : memref<64x64xf32, #tpu.memory_space<vmem>>, vector<8x32xf32>
    tpu.vector_store %arg5[%226, %c0_64], %225 {strides = array<i32>} : memref<64x64xf32, #tpu.memory_space<vmem>>, vector<8x32xf32>,
    %228 = vector.extract_strided_slice %224 {offsets = [0, 32], sizes = [8, 32], strides = [1, 1]} : vector<8x64xf32> to vector<8x32xf32>
    %229 = arith.index_cast %203 : i32 to index
    %c32_65 = arith.constant 32 : index
    %230 = vector.load %arg5[%229, %c32_65] : memref<64x64xf32, #tpu.memory_space<vmem>>, vector<8x32xf32>
    tpu.vector_store %arg5[%229, %c32_65], %228 {strides = array<i32>} : memref<64x64xf32, #tpu.memory_space<vmem>>, vector<8x32xf32>,
    %c7_i32_66 = arith.constant 7 : i32
    %c8_i32_67 = arith.constant 8 : i32
    %231 = arith.muli %c7_i32_66, %c8_i32_67 : i32
    %232 = tpu.assume_multiple %231, 8 : i32
    %c7_i32_68 = arith.constant 7 : i32
    %233 = arith.subi %c7_i32_68, %c7_i32_66 : i32
    %c8_i32_69 = arith.constant 8 : i32
    %234 = arith.muli %233, %c8_i32_69 : i32
    %235 = tpu.assume_multiple %234, 8 : i32
    %236 = arith.index_cast %232 : i32 to index
    %c0_70 = arith.constant 0 : index
    %237 = vector.load %arg0[%236, %c0_70] : memref<64x256xf32, #tpu.memory_space<vmem>>, vector<8x256xf32>
    %c0_71 = arith.constant 0 : index
    %c0_72 = arith.constant 0 : index
    %238 = vector.load %arg1[%c0_71, %c0_72] : memref<64x256xf32, #tpu.memory_space<vmem>>, vector<64x256xf32>
    %cst_73 = arith.constant dense<0.000000e+00> : vector<8x256xf32>
    %239 = tpu.matmul %224, %238, %cst_73 {dimension_numbers = #tpu.dot_dimension_numbers<[1], [0], [0], [1], [0, 0, 1, 1], [], []>} : vector<8x64xf32>, vector<64x256xf32>, vector<8x256xf32> -> vector<8x256xf32>
    %240 = arith.addf %237, %239 : vector<8x256xf32>
    %241 = math.tanh %240 : vector<8x256xf32>
    %242 = arith.negf %240 : vector<8x256xf32>
    %243 = math.exp %242 : vector<8x256xf32>
    %cst_74 = arith.constant 1.000000e+00 : f32
    %244 = vector.broadcast %cst_74 : f32 to vector<8x256xf32>
    %245 = arith.addf %244, %243 : vector<8x256xf32>
    %246 = arith.divf %244, %245 : vector<8x256xf32>
    %247 = arith.select %5, %241, %246 : vector<8x256xi1>, vector<8x256xf32>
    %248 = vector.extract_strided_slice %247 {offsets = [0, 0], sizes = [8, 64], strides = [1, 1]} : vector<8x256xf32> to vector<8x64xf32>
    %249 = vector.extract_strided_slice %247 {offsets = [0, 64], sizes = [8, 64], strides = [1, 1]} : vector<8x256xf32> to vector<8x64xf32>
    %250 = vector.extract_strided_slice %247 {offsets = [0, 128], sizes = [8, 64], strides = [1, 1]} : vector<8x256xf32> to vector<8x64xf32>
    %251 = vector.extract_strided_slice %247 {offsets = [0, 192], sizes = [8, 64], strides = [1, 1]} : vector<8x256xf32> to vector<8x64xf32>
    %252 = arith.mulf %249, %222 : vector<8x64xf32>
    %253 = arith.mulf %248, %250 : vector<8x64xf32>
    %254 = arith.addf %252, %253 : vector<8x64xf32>
    %255 = math.tanh %254 : vector<8x64xf32>
    %256 = arith.mulf %251, %255 : vector<8x64xf32>
    %257 = vector.extract_strided_slice %256 {offsets = [0, 0], sizes = [8, 32], strides = [1, 1]} : vector<8x64xf32> to vector<8x32xf32>
    %258 = arith.index_cast %232 : i32 to index
    %c0_75 = arith.constant 0 : index
    %259 = vector.load %arg5[%258, %c0_75] : memref<64x64xf32, #tpu.memory_space<vmem>>, vector<8x32xf32>
    tpu.vector_store %arg5[%258, %c0_75], %257 {strides = array<i32>} : memref<64x64xf32, #tpu.memory_space<vmem>>, vector<8x32xf32>,
    %260 = vector.extract_strided_slice %256 {offsets = [0, 32], sizes = [8, 32], strides = [1, 1]} : vector<8x64xf32> to vector<8x32xf32>
    %261 = arith.index_cast %235 : i32 to index
    %c32_76 = arith.constant 32 : index
    %262 = vector.load %arg5[%261, %c32_76] : memref<64x64xf32, #tpu.memory_space<vmem>>, vector<8x32xf32>
    tpu.vector_store %arg5[%261, %c32_76], %260 {strides = array<i32>} : memref<64x64xf32, #tpu.memory_space<vmem>>, vector<8x32xf32>,
    %c8_i32_77 = arith.constant 8 : i32
    %c0_78 = arith.constant 0 : index
    %c0_79 = arith.constant 0 : index
    %263 = vector.load %arg5[%c0_78, %c0_79] : memref<64x64xf32, #tpu.memory_space<vmem>>, vector<64x64xf32>
    %c0_80 = arith.constant 0 : index
    %c0_81 = arith.constant 0 : index
    %264 = vector.load %arg2[%c0_80, %c0_81] : memref<64x128xf32, #tpu.memory_space<vmem>>, vector<64x128xf32>
    %cst_82 = arith.constant dense<0.000000e+00> : vector<64x128xf32>
    %265 = tpu.matmul %263, %264, %cst_82 {dimension_numbers = #tpu.dot_dimension_numbers<[1], [0], [0], [1], [0, 0, 1, 1], [], []>} : vector<64x64xf32>, vector<64x128xf32>, vector<64x128xf32> -> vector<64x128xf32>
    %c0_83 = arith.constant 0 : index
    %c0_84 = arith.constant 0 : index
    %266 = vector.load %arg3[%c0_83, %c0_84] : memref<1x128xf32, #tpu.memory_space<vmem>>, vector<1x128xf32>
    %267 = vector.broadcast %266 : vector<1x128xf32> to vector<64x128xf32>
    %268 = arith.addf %265, %267 : vector<64x128xf32>
    %c0_85 = arith.constant 0 : index
    %c0_86 = arith.constant 0 : index
    %269 = vector.load %arg4[%c0_85, %c0_86] : memref<64x128xf32, #tpu.memory_space<vmem>>, vector<64x128xf32>
    tpu.vector_store %arg4[%c0_85, %c0_86], %268 {strides = array<i32>} : memref<64x128xf32, #tpu.memory_space<vmem>>, vector<64x128xf32>,
    return
  }
}

</mosaic_0001>

<bundles_post_ra>
// kernel: bilstm_forward.1
= control target key start
LH: loop header
LB: loop body
LE: loop exit
PB: predicated region body
PF: predicated region fallthrough
CT: control target
= control target key end

     0   :  { %v1412_v3 = vmov 0.0   ;;  %v17_v29 = vlaneseq  ;;  %s1413_s24 = smov 64   ;;  %vm153_vm1 = vcmask 261120   ;;  %vm156_vm2 = vcmask 523520   ;;  %s1821_s1 = inlined_call_operand.vmem [shape: f32[64,256], index: 1, kind: input, shape index: {}]   ;;  %s1822_s0 = inlined_call_operand.vmem [shape: f32[64,256], index: 0, kind: input, shape index: {}]   ;;  %s1823_s2 = inlined_call_operand.vmem [shape: f32[64,128], index: 2, kind: input, shape index: {}]   ;;  %s1824_s3 = inlined_call_operand.vmem [shape: f32[1,128], index: 3, kind: input, shape index: {}]   ;;  %s1825_s4 = inlined_call_operand.vmem [shape: f32[64,128], index: 4, kind: output, shape index: {}]  }
   0x1   :  { %v1442_v0 = vld [vmem:[%s1821_s1 + $0x78] sm:$0xff]  ;;  %v1447_v1 = vld [vmem:[%s1821_s1 + $0x70] sm:$0xff]  ;;  %v1452_v2 = vld [vmem:[%s1821_s1 + $0x68] sm:$0xff]  ;;  %115 = vmatprep.mubr.f32.mxu1 %v1412_v3  ;;  %374 = vmatprep.mubr.f32.mxu0 %v1412_v3  ;;  %vm47_vm3 = vcmask 523264  }
   0x2   :  { %67 = vmatprep.subr.mxu1 %v1442_v0  ;;  %v1460_v4 = vld [vmem:[%s1821_s1 + $0x60] sm:$0xff]  ;;  %326 = vmatprep.subr.mxu0 %v1442_v0  ;;  %v1467_v5 = vld [vmem:[%s1821_s1 + $0x58] sm:$0xff]  ;;  %v1474_v6 = vld [vmem:[%s1821_s1 + $0x50] sm:$0xff]  ;;  %v18_v30 = vand.u32 127, %v17_v29 }
   0x3   :  { %68 = vmatpush1.msra.mxu1 %v1447_v1  ;;  %327 = vmatpush1.msra.mxu0 %v1447_v1  ;;  %v1481_v7 = vld [vmem:[%s1821_s1 + $0x48] sm:$0xff]  ;;  %v1488_v8 = vld [vmem:[%s1821_s1 + $0x40] sm:$0xff]  ;;  %v1495_v9 = vld [vmem:[%s1821_s1 + $0x38] sm:$0xff] }
   0x4   :  { %69 = vmatprep.subr.mxu1 %v1452_v2  ;;  %328 = vmatprep.subr.mxu0 %v1452_v2  ;;  %v1502_v10 = vld [vmem:[%s1821_s1 + $0x30] sm:$0xff]  ;;  %v1509_v11 = vld [vmem:[%s1821_s1 + $0x28] sm:$0xff]  ;;  %v1516_v12 = vld [vmem:[%s1821_s1 + $0x20] sm:$0xff]  ;;  %v1579_v31 = vadd.s32 128, %v18_v30 }
   0x5   :  { %70 = vmatpush1.msra.mxu1 %v1460_v4  ;;  %329 = vmatpush1.msra.mxu0 %v1460_v4  ;;  %v1523_v13 = vld [vmem:[%s1821_s1 + $0x18] sm:$0xff]  ;;  %v1530_v14 = vld [vmem:[%s1821_s1 + $0x10] sm:$0xff]  ;;  %v1537_v15 = vld [vmem:[%s1821_s1 + $0x8] sm:$0xff] }
   0x6   :  { %71 = vmatprep.subr.mxu1 %v1467_v5  ;;  %330 = vmatprep.subr.mxu0 %v1467_v5  ;;  %v1544_v16 = vld [vmem:[%s1821_s1] sm:$0xff]  ;;  %v30_v19 = vld [vmem:[%s1822_s0 + $0x8] sm:$0xff]  ;;  %vm23_vm0 = vcmp.lt.s32.totalorder %v1579_v31, 192  ;;  %v1226_v43 = vld [vmem:[%s1822_s0 + $0x10] sm:$0xff] }
   0x7   :  { %72 = vmatpush1.msra.mxu1 %v1474_v6  ;;  %331 = vmatpush1.msra.mxu0 %v1474_v6  ;;  %v29_v17 = vld [vmem:[%s1822_s0] sm:$0xff]  ;;  %v1227_v45 = vld [vmem:[%s1822_s0 + $0x18] sm:$0xff] }
   0x8   :  { %73 = vmatprep.subr.mxu1 %v1481_v7  ;;  %332 = vmatprep.subr.mxu0 %v1481_v7  ;;  %v1065_v31 = vld [vmem:[%s1823_s2 + $0x20] sm:$0xff] }
   0x9   :  { %74 = vmatpush1.msra.mxu1 %v1488_v8  ;;  %333 = vmatpush1.msra.mxu0 %v1488_v8 }
   0xa   :  { %75 = vmatprep.subr.mxu1 %v1495_v9  ;;  %334 = vmatprep.subr.mxu0 %v1495_v9 }
   0xb   :  { %76 = vmatpush1.msra.mxu1 %v1502_v10  ;;  %335 = vmatpush1.msra.mxu0 %v1502_v10 }
   0xc   :  { %77 = vmatprep.subr.mxu1 %v1509_v11  ;;  %336 = vmatprep.subr.mxu0 %v1509_v11 }
   0xd   :  { %78 = vmatpush1.msra.mxu1 %v1516_v12  ;;  %337 = vmatpush1.msra.mxu0 %v1516_v12 }
   0xe   :  { %79 = vmatprep.subr.mxu1 %v1523_v13  ;;  %338 = vmatprep.subr.mxu0 %v1523_v13 }
   0xf   :  { %80 = vmatpush1.msra.mxu1 %v1530_v14  ;;  %339 = vmatpush1.msra.mxu0 %v1530_v14 }
  0x10   :  { %81 = vmatprep.subr.mxu1 %v1537_v15  ;;  %340 = vmatprep.subr.mxu0 %v1537_v15 }
  0x11   :  { %82 = vmatpush1.msra.mxu1 %v1544_v16  ;;  %341 = vmatpush1.msra.mxu0 %v1544_v16 }
  0x12   :  { %116 = vmatmul.mubr.f32.vlgmr.msra.gmra.mxu1 %v1412_v3  ;;  %197 = vmatprep.subr.mxu1 %v1442_v0 }
  0x13   :  { %198 = vmatpush1.msra.mxu1 %v1447_v1  ;;  %245 = vmatprep.mubr.f32.mxu1 %v1412_v3 }
  0x14   :  { %199 = vmatprep.subr.mxu1 %v1452_v2  ;;  %584 = vmatprep.subr.mxu0 %v1442_v0 }
  0x15   :  { %200 = vmatpush1.msra.mxu1 %v1460_v4 }
  0x16   :  { %201 = vmatprep.subr.mxu1 %v1467_v5 }
  0x17   :  { %202 = vmatpush1.msra.mxu1 %v1474_v6 }
  0x18   :  { %203 = vmatprep.subr.mxu1 %v1481_v7 }
  0x19   :  { %204 = vmatpush1.msra.mxu1 %v1488_v8 }
  0x1a   :  { %205 = vmatprep.subr.mxu1 %v1495_v9 }
  0x1b   :  { %206 = vmatpush1.msra.mxu1 %v1502_v10 }
  0x1c   :  { %207 = vmatprep.subr.mxu1 %v1509_v11 }
  0x1d   :  { %208 = vmatpush1.msra.mxu1 %v1516_v12 }
  0x1e   :  { %209 = vmatprep.subr.mxu1 %v1523_v13 }
  0x1f   :  { %210 = vmatpush1.msra.mxu1 %v1530_v14 }
  0x20   :  { %211 = vmatprep.subr.mxu1 %v1537_v15 }
  0x21   :  { %212 = vmatpush1.msra.mxu1 %v1544_v16 }
  0x22   :  { %455 = vmatprep.subr.mxu1 %v1442_v0 }
  0xd2   :  { %v117_v18 = vpop.f32.mrf.mxu1 }
  0xd3   :  { %v122_v20 = vadd.f32 %v117_v18, %v29_v17 }
  0xd4   :  { %v119_v21 = vpop.f32.mrf.mxu1 }
  0xd5   :  { %v1224_v22 = vmul.f32 -1.442695, %v122_v20  ;;  %v123_v23 = vadd.f32 %v119_v21, %v30_v19  ;;  %v1231_v19 = vld [vmem:[%s1822_s0 + $0x20] sm:$0xff]  ;;  %v1232_v21 = vld [vmem:[%s1822_s0 + $0x28] sm:$0xff] }
  0xd7   :  { %1316 = vpow2.f32 %v1224_v22  ;;  %v1225_v24 = vmul.f32 -1.442695, %v123_v23 }
  0xd9   :  { %1318 = vpow2.f32 %v1225_v24 }
  0xda   :  { %1320 = vtanh.f32 %v123_v23 }
  0xe4   :  { %v1317_v25 = vpop.eup %1316 }
  0xe5   :  { %v132_v27 = vadd.f32 1.0, %v1317_v25 }
  0xe6   :  { %v1319_v26 = vpop.eup %1318 }
  0xe7   :  { %v133_v28 = vadd.f32 1.0, %v1319_v26  ;;  %v1321_v32 = vpop.eup %1320 }
  0xe9   :  { %1322 = vrcp.f32 %v133_v28 }
  0xea   :  { %1324 = vrcp.f32 %v132_v27 }
  0xf6   :  { %v1323_v33 = vpop.eup %1322 }
  0xf7   :  { %v1325_v34 = vpop.eup %1324  ;;  %v139_v35 = vsel %vm23_vm0, %v1321_v32, %v1323_v33 }
  0xf8   :  { %v141_v36 = vmul.f32 %v1325_v34, %v139_v35  ;;  %v140_v37 = vmul.f32 0.0, %v1325_v34 }
  0xfa   :  { %143 = vrot.lane.b32.xlu0 %v141_v36, %s1413_s24 }
 0x16c   :  { %v144_v38 = vpop.permute.xlu0 %143 }
 0x16d   :  { %v146_v39 = vadd.f32 %v144_v38, %v140_v37 }
 0x16f   :  { %1326 = vtanh.f32 %v146_v39 }
 0x17c   :  { %v1327_v40 = vpop.eup %1326 }
 0x17d   :  { %v148_v41 = vmul.f32 %v1327_v40, %v139_v35 }
 0x17f   :  { %150 = vrot.lane.b32.xlu0 %v148_v41, %s1413_s24 }
 0x1f1   :  { %v151_v42 = vpop.permute.xlu0 %150 }
 0x1f2   :  { %154 = vst.msk [vmem:[#allocation2] sm:$0xff] %vm153_vm1, %v151_v42  ;;  %1228 = vmatmul.mubr.msk.f32.vlgmr.msra.gmra.mxu1 %vm47_vm3, %v151_v42 }
 0x1f3   :  { %157 = vst.msk [vmem:[#allocation2 + $0x38] sm:$0xff] %vm156_vm2, %v151_v42  ;;  %456 = vmatpush1.msra.mxu1 %v1447_v1  ;;  %503 = vmatprep.mubr.f32.mxu1 %v1412_v3 }
 0x1f4   :  { %457 = vmatprep.subr.mxu1 %v1452_v2 }
 0x1f5   :  { %458 = vmatpush1.msra.mxu1 %v1460_v4 }
 0x1f6   :  { %459 = vmatprep.subr.mxu1 %v1467_v5 }
 0x1f7   :  { %460 = vmatpush1.msra.mxu1 %v1474_v6 }
 0x1f8   :  { %461 = vmatprep.subr.mxu1 %v1481_v7 }
 0x1f9   :  { %462 = vmatpush1.msra.mxu1 %v1488_v8 }
 0x1fa   :  { %463 = vmatprep.subr.mxu1 %v1495_v9 }
 0x1fb   :  { %464 = vmatpush1.msra.mxu1 %v1502_v10 }
 0x1fc   :  { %465 = vmatprep.subr.mxu1 %v1509_v11 }
 0x1fd   :  { %466 = vmatpush1.msra.mxu1 %v1516_v12 }
 0x1fe   :  { %467 = vmatprep.subr.mxu1 %v1523_v13 }
 0x1ff   :  { %468 = vmatpush1.msra.mxu1 %v1530_v14 }
 0x200   :  { %469 = vmatprep.subr.mxu1 %v1537_v15 }
 0x201   :  { %470 = vmatpush1.msra.mxu1 %v1544_v16 }
 0x202   :  { %711 = vmatprep.subr.mxu1 %v1442_v0 }
 0x2b2   :  { %v247_v44 = vpop.f32.mrf.mxu1 }
 0x2b3   :  { %v252_v46 = vadd.f32 %v1226_v43, %v247_v44  ;;  %v1236_v43 = vld [vmem:[%s1822_s0 + $0x30] sm:$0xff] }
 0x2b4   :  { %v249_v47 = vpop.f32.mrf.mxu1 }
 0x2b5   :  { %v1229_v48 = vmul.f32 -1.442695, %v252_v46  ;;  %v253_v49 = vadd.f32 %v1227_v45, %v249_v47  ;;  %v1237_v45 = vld [vmem:[%s1822_s0 + $0x38] sm:$0xff] }
 0x2b7   :  { %1328 = vpow2.f32 %v1229_v48  ;;  %v1230_v50 = vmul.f32 -1.442695, %v253_v49 }
 0x2b9   :  { %1330 = vpow2.f32 %v1230_v50 }
 0x2ba   :  { %1332 = vtanh.f32 %v253_v49 }
 0x2c4   :  { %v1329_v51 = vpop.eup %1328 }
 0x2c5   :  { %v262_v53 = vadd.f32 1.0, %v1329_v51 }
 0x2c6   :  { %v1331_v52 = vpop.eup %1330 }
 0x2c7   :  { %v263_v54 = vadd.f32 1.0, %v1331_v52  ;;  %v1333_v55 = vpop.eup %1332 }
 0x2c9   :  { %1334 = vrcp.f32 %v263_v54 }
 0x2ca   :  { %1336 = vrcp.f32 %v262_v53 }
 0x2d6   :  { %v1335_v56 = vpop.eup %1334 }
 0x2d7   :  { %v1337_v57 = vpop.eup %1336  ;;  %v269_v58 = vsel %vm23_vm0, %v1333_v55, %v1335_v56 }
 0x2d8   :  { %v271_v59 = vmul.f32 %v1337_v57, %v269_v58  ;;  %v270_v60 = vmul.f32 %v1337_v57, %v146_v39 }
 0x2da   :  { %273 = vrot.lane.b32.xlu1 %v271_v59, %s1413_s24 }
 0x34c   :  { %v274_v61 = vpop.permute.xlu1 %273 }
 0x34d   :  { %v276_v62 = vadd.f32 %v274_v61, %v270_v60 }
 0x34f   :  { %1338 = vtanh.f32 %v276_v62 }
 0x35c   :  { %v1339_v63 = vpop.eup %1338 }
 0x35d   :  { %v278_v17 = vmul.f32 %v1339_v63, %v269_v58 }
 0x35f   :  { %280 = vrot.lane.b32.xlu1 %v278_v17, %s1413_s24 }
 0x3d1   :  { %v281_v18 = vpop.permute.xlu1 %280 }
 0x3d2   :  { %284 = vst.msk [vmem:[#allocation2 + $0x8] sm:$0xff] %vm153_vm1, %v281_v18  ;;  %1233 = vmatmul.mubr.msk.f32.vlgmr.msra.gmra.mxu0 %vm47_vm3, %v281_v18 }
 0x3d3   :  { %286 = vst.msk [vmem:[#allocation2 + $0x30] sm:$0xff] %vm156_vm2, %v281_v18  ;;  %585 = vmatpush1.msra.mxu0 %v1447_v1  ;;  %632 = vmatprep.mubr.f32.mxu0 %v1412_v3  ;;  %v1241_v18 = vld [vmem:[%s1822_s0 + $0x40] sm:$0xff] }
 0x3d4   :  { %586 = vmatprep.subr.mxu0 %v1452_v2 }
 0x3d5   :  { %587 = vmatpush1.msra.mxu0 %v1460_v4 }
 0x3d6   :  { %588 = vmatprep.subr.mxu0 %v1467_v5 }
 0x3d7   :  { %589 = vmatpush1.msra.mxu0 %v1474_v6 }
 0x3d8   :  { %590 = vmatprep.subr.mxu0 %v1481_v7 }
 0x3d9   :  { %591 = vmatpush1.msra.mxu0 %v1488_v8 }
 0x3da   :  { %592 = vmatprep.subr.mxu0 %v1495_v9 }
 0x3db   :  { %593 = vmatpush1.msra.mxu0 %v1502_v10 }
 0x3dc   :  { %594 = vmatprep.subr.mxu0 %v1509_v11 }
 0x3dd   :  { %595 = vmatpush1.msra.mxu0 %v1516_v12 }
 0x3de   :  { %596 = vmatprep.subr.mxu0 %v1523_v13 }
 0x3df   :  { %597 = vmatpush1.msra.mxu0 %v1530_v14 }
 0x3e0   :  { %598 = vmatprep.subr.mxu0 %v1537_v15 }
 0x3e1   :  { %599 = vmatpush1.msra.mxu0 %v1544_v16 }
 0x3e2   :  { %838 = vmatprep.subr.mxu0 %v1442_v0 }
 0x492   :  { %v376_v20 = vpop.f32.mrf.mxu0 }
 0x493   :  { %v381_v22 = vadd.f32 %v1231_v19, %v376_v20  ;;  %v1242_v20 = vld [vmem:[%s1822_s0 + $0x48] sm:$0xff] }
 0x494   :  { %v378_v23 = vpop.f32.mrf.mxu0 }
 0x495   :  { %v1234_v24 = vmul.f32 -1.442695, %v381_v22  ;;  %v382_v25 = vadd.f32 %v1232_v21, %v378_v23 }
 0x497   :  { %1340 = vpow2.f32 %v1234_v24  ;;  %v1235_v26 = vmul.f32 -1.442695, %v382_v25 }
 0x499   :  { %1342 = vpow2.f32 %v1235_v26 }
 0x49a   :  { %1344 = vtanh.f32 %v382_v25 }
 0x4a4   :  { %v1341_v27 = vpop.eup %1340 }
 0x4a5   :  { %v391_v29 = vadd.f32 1.0, %v1341_v27 }
 0x4a6   :  { %v1343_v28 = vpop.eup %1342 }
 0x4a7   :  { %v392_v30 = vadd.f32 1.0, %v1343_v28  ;;  %v1345_v32 = vpop.eup %1344 }
 0x4a9   :  { %1346 = vrcp.f32 %v392_v30 }
 0x4aa   :  { %1348 = vrcp.f32 %v391_v29 }
 0x4b6   :  { %v1347_v33 = vpop.eup %1346 }
 0x4b7   :  { %v1349_v34 = vpop.eup %1348  ;;  %v398_v35 = vsel %vm23_vm0, %v1345_v32, %v1347_v33 }
 0x4b8   :  { %v400_v36 = vmul.f32 %v1349_v34, %v398_v35  ;;  %v399_v37 = vmul.f32 %v1349_v34, %v276_v62 }
 0x4ba   :  { %402 = vrot.lane.b32.xlu0 %v400_v36, %s1413_s24 }
 0x52c   :  { %v403_v38 = vpop.permute.xlu0 %402 }
 0x52d   :  { %v405_v39 = vadd.f32 %v403_v38, %v399_v37 }
 0x52f   :  { %1350 = vtanh.f32 %v405_v39 }
 0x53c   :  { %v1351_v40 = vpop.eup %1350 }
 0x53d   :  { %v407_v41 = vmul.f32 %v1351_v40, %v398_v35 }
 0x53f   :  { %409 = vrot.lane.b32.xlu1 %v407_v41, %s1413_s24 }
 0x5b1   :  { %v410_v42 = vpop.permute.xlu1 %409 }
 0x5b2   :  { %413 = vst.msk [vmem:[#allocation2 + $0x10] sm:$0xff] %vm153_vm1, %v410_v42  ;;  %1238 = vmatmul.mubr.msk.f32.vlgmr.msra.gmra.mxu1 %vm47_vm3, %v410_v42 }
 0x5b3   :  { %415 = vst.msk [vmem:[#allocation2 + $0x28] sm:$0xff] %vm156_vm2, %v410_v42  ;;  %712 = vmatpush1.msra.mxu1 %v1447_v1  ;;  %759 = vmatprep.mubr.f32.mxu1 %v1412_v3 }
 0x5b4   :  { %713 = vmatprep.subr.mxu1 %v1452_v2 }
 0x5b5   :  { %714 = vmatpush1.msra.mxu1 %v1460_v4 }
 0x5b6   :  { %715 = vmatprep.subr.mxu1 %v1467_v5 }
 0x5b7   :  { %716 = vmatpush1.msra.mxu1 %v1474_v6 }
 0x5b8   :  { %717 = vmatprep.subr.mxu1 %v1481_v7 }
 0x5b9   :  { %718 = vmatpush1.msra.mxu1 %v1488_v8 }
 0x5ba   :  { %719 = vmatprep.subr.mxu1 %v1495_v9 }
 0x5bb   :  { %720 = vmatpush1.msra.mxu1 %v1502_v10 }
 0x5bc   :  { %721 = vmatprep.subr.mxu1 %v1509_v11 }
 0x5bd   :  { %722 = vmatpush1.msra.mxu1 %v1516_v12 }
 0x5be   :  { %723 = vmatprep.subr.mxu1 %v1523_v13 }
 0x5bf   :  { %724 = vmatpush1.msra.mxu1 %v1530_v14 }
 0x5c0   :  { %725 = vmatprep.subr.mxu1 %v1537_v15 }
 0x5c1   :  { %726 = vmatpush1.msra.mxu1 %v1544_v16 }
 0x5c2   :  { %965 = vmatprep.subr.mxu1 %v1442_v0 }
 0x672   :  { %v505_v44 = vpop.f32.mrf.mxu1 }
 0x673   :  { %v510_v46 = vadd.f32 %v1236_v43, %v505_v44 }
 0x674   :  { %v507_v47 = vpop.f32.mrf.mxu1 }
 0x675   :  { %v1239_v48 = vmul.f32 -1.442695, %v510_v46  ;;  %v511_v49 = vadd.f32 %v1237_v45, %v507_v47 }
 0x677   :  { %1352 = vpow2.f32 %v1239_v48  ;;  %v1240_v50 = vmul.f32 -1.442695, %v511_v49 }
 0x679   :  { %1354 = vpow2.f32 %v1240_v50 }
 0x67a   :  { %1356 = vtanh.f32 %v511_v49  ;;  %v1251_v49 = vld [vmem:[%s1822_s0 + $0x60] sm:$0xff] }
 0x684   :  { %v1353_v51 = vpop.eup %1352 }
 0x685   :  { %v520_v53 = vadd.f32 1.0, %v1353_v51  ;;  %v1252_v51 = vld [vmem:[%s1822_s0 + $0x68] sm:$0xff] }
 0x686   :  { %v1355_v52 = vpop.eup %1354 }
 0x687   :  { %v521_v0 = vadd.f32 1.0, %v1355_v52  ;;  %v1357_v54 = vpop.eup %1356 }
 0x689   :  { %1358 = vrcp.f32 %v521_v0 }
 0x68a   :  { %1360 = vrcp.f32 %v520_v53 }
 0x696   :  { %v1359_v55 = vpop.eup %1358 }
 0x697   :  { %v1361_v56 = vpop.eup %1360  ;;  %v527_v57 = vsel %vm23_vm0, %v1357_v54, %v1359_v55 }
 0x698   :  { %v529_v58 = vmul.f32 %v1361_v56, %v527_v57  ;;  %v528_v59 = vmul.f32 %v1361_v56, %v405_v39 }
 0x69a   :  { %531 = vrot.lane.b32.xlu0 %v529_v58, %s1413_s24 }
 0x70c   :  { %v532_v60 = vpop.permute.xlu0 %531 }
 0x70d   :  { %v534_v61 = vadd.f32 %v532_v60, %v528_v59 }
 0x70f   :  { %1362 = vtanh.f32 %v534_v61 }
 0x71c   :  { %v1363_v62 = vpop.eup %1362 }
 0x71d   :  { %v536_v63 = vmul.f32 %v1363_v62, %v527_v57 }
 0x71f   :  { %538 = vrot.lane.b32.xlu1 %v536_v63, %s1413_s24 }
 0x791   :  { %v539_v17 = vpop.permute.xlu1 %538 }
 0x792   :  { %542 = vst.msk [vmem:[#allocation2 + $0x18] sm:$0xff] %vm153_vm1, %v539_v17  ;;  %1243 = vmatmul.mubr.msk.f32.vlgmr.msra.gmra.mxu0 %vm47_vm3, %v539_v17 }
 0x793   :  { %544 = vst.msk [vmem:[#allocation2 + $0x20] sm:$0xff] %vm156_vm2, %v539_v17  ;;  %839 = vmatpush1.msra.mxu0 %v1447_v1  ;;  %886 = vmatprep.mubr.f32.mxu0 %v1412_v3 }
 0x794   :  { %840 = vmatprep.subr.mxu0 %v1452_v2 }
 0x795   :  { %841 = vmatpush1.msra.mxu0 %v1460_v4 }
 0x796   :  { %842 = vmatprep.subr.mxu0 %v1467_v5 }
 0x797   :  { %843 = vmatpush1.msra.mxu0 %v1474_v6 }
 0x798   :  { %844 = vmatprep.subr.mxu0 %v1481_v7 }
 0x799   :  { %845 = vmatpush1.msra.mxu0 %v1488_v8 }
 0x79a   :  { %846 = vmatprep.subr.mxu0 %v1495_v9 }
 0x79b   :  { %847 = vmatpush1.msra.mxu0 %v1502_v10 }
 0x79c   :  { %848 = vmatprep.subr.mxu0 %v1509_v11 }
 0x79d   :  { %849 = vmatpush1.msra.mxu0 %v1516_v12 }
 0x79e   :  { %850 = vmatprep.subr.mxu0 %v1523_v13 }
 0x79f   :  { %851 = vmatpush1.msra.mxu0 %v1530_v14 }
 0x7a0   :  { %852 = vmatprep.subr.mxu0 %v1537_v15 }
 0x7a1   :  { %853 = vmatpush1.msra.mxu0 %v1544_v16 }
 0x852   :  { %v634_v19 = vpop.f32.mrf.mxu0 }
 0x853   :  { %v639_v21 = vadd.f32 %v1241_v18, %v634_v19 }
 0x854   :  { %v636_v22 = vpop.f32.mrf.mxu0 }
 0x855   :  { %v1244_v23 = vmul.f32 -1.442695, %v639_v21  ;;  %v640_v24 = vadd.f32 %v1242_v20, %v636_v22 }
 0x857   :  { %1364 = vpow2.f32 %v1244_v23  ;;  %v1245_v25 = vmul.f32 -1.442695, %v640_v24 }
 0x859   :  { %1366 = vpow2.f32 %v1245_v25 }
 0x85a   :  { %1368 = vtanh.f32 %v640_v24  ;;  %v1256_v24 = vld [vmem:[%s1822_s0 + $0x70] sm:$0xff] }
 0x864   :  { %v1365_v26 = vpop.eup %1364 }
 0x865   :  { %v649_v28 = vadd.f32 1.0, %v1365_v26  ;;  %v1257_v26 = vld [vmem:[%s1822_s0 + $0x78] sm:$0xff] }
 0x866   :  { %v1367_v27 = vpop.eup %1366 }
 0x867   :  { %v650_v29 = vadd.f32 1.0, %v1367_v27  ;;  %v1369_v30 = vpop.eup %1368 }
 0x869   :  { %1370 = vrcp.f32 %v650_v29 }
 0x86a   :  { %1372 = vrcp.f32 %v649_v28 }
 0x876   :  { %v1371_v32 = vpop.eup %1370 }
 0x877   :  { %v1373_v33 = vpop.eup %1372  ;;  %v656_v34 = vsel %vm23_vm0, %v1369_v30, %v1371_v32 }
 0x878   :  { %v658_v35 = vmul.f32 %v1373_v33, %v656_v34  ;;  %v657_v36 = vmul.f32 %v1373_v33, %v534_v61 }
 0x87a   :  { %660 = vrot.lane.b32.xlu0 %v658_v35, %s1413_s24 }
 0x8ec   :  { %v661_v37 = vpop.permute.xlu0 %660 }
 0x8ed   :  { %v663_v38 = vadd.f32 %v661_v37, %v657_v36 }
 0x8ef   :  { %1374 = vtanh.f32 %v663_v38 }
 0x8fc   :  { %v1375_v39 = vpop.eup %1374 }
 0x8fd   :  { %v665_v40 = vmul.f32 %v1375_v39, %v656_v34 }
 0x8ff   :  { %667 = vrot.lane.b32.xlu1 %v665_v40, %s1413_s24 }
 0x971   :  { %v668_v41 = vpop.permute.xlu1 %667 }
 0x972   :  { %670 = vst.msk [vmem:[#allocation2 + $0x20] sm:$0xff] %vm153_vm1, %v668_v41  ;;  %1248 = vmatmul.mubr.msk.f32.vlgmr.msra.gmra.mxu1 %vm47_vm3, %v668_v41 }
 0x973   :  { %671 = vst.msk [vmem:[#allocation2 + $0x18] sm:$0xff] %vm156_vm2, %v668_v41  ;;  %966 = vmatpush1.msra.mxu1 %v1447_v1  ;;  %1013 = vmatprep.mubr.f32.mxu1 %v1412_v3  ;;  %v1246_v1 = vld [vmem:[%s1822_s0 + $0x50] sm:$0xff]  ;;  %v1247_v3 = vld [vmem:[%s1822_s0 + $0x58] sm:$0xff] }
 0x974   :  { %967 = vmatprep.subr.mxu1 %v1452_v2 }
 0x975   :  { %968 = vmatpush1.msra.mxu1 %v1460_v4 }
 0x976   :  { %969 = vmatprep.subr.mxu1 %v1467_v5 }
 0x977   :  { %970 = vmatpush1.msra.mxu1 %v1474_v6 }
 0x978   :  { %971 = vmatprep.subr.mxu1 %v1481_v7 }
 0x979   :  { %972 = vmatpush1.msra.mxu1 %v1488_v8 }
 0x97a   :  { %973 = vmatprep.subr.mxu1 %v1495_v9 }
 0x97b   :  { %974 = vmatpush1.msra.mxu1 %v1502_v10 }
 0x97c   :  { %975 = vmatprep.subr.mxu1 %v1509_v11 }
 0x97d   :  { %976 = vmatpush1.msra.mxu1 %v1516_v12 }
 0x97e   :  { %977 = vmatprep.subr.mxu1 %v1523_v13 }
 0x97f   :  { %978 = vmatpush1.msra.mxu1 %v1530_v14 }
 0x980   :  { %979 = vmatprep.subr.mxu1 %v1537_v15 }
 0x981   :  { %980 = vmatpush1.msra.mxu1 %v1544_v16 }
 0xa32   :  { %v761_v2 = vpop.f32.mrf.mxu1 }
 0xa33   :  { %v766_v4 = vadd.f32 %v1246_v1, %v761_v2  ;;  %v1068_v1 = vld [vmem:[%s1823_s2 + $0x38] sm:$0xff]  ;;  %v1067_v2 = vld [vmem:[%s1823_s2 + $0x30] sm:$0xff] }
 0xa34   :  { %v763_v5 = vpop.f32.mrf.mxu1  ;;  %1286 = vmatprep.subr.mxu0 %v1068_v1 }
 0xa35   :  { %v1249_v6 = vmul.f32 -1.442695, %v766_v4  ;;  %v767_v7 = vadd.f32 %v1247_v3, %v763_v5  ;;  %v1066_v3 = vld [vmem:[%s1823_s2 + $0x28] sm:$0xff] }
 0xa37   :  { %1376 = vpow2.f32 %v1249_v6  ;;  %v1250_v8 = vmul.f32 -1.442695, %v767_v7 }
 0xa39   :  { %1378 = vpow2.f32 %v1250_v8  ;;  %v1063_v8 = vld [vmem:[%s1823_s2 + $0x10] sm:$0xff] }
 0xa3a   :  { %1380 = vtanh.f32 %v767_v7  ;;  %v1064_v7 = vld [vmem:[%s1823_s2 + $0x18] sm:$0xff] }
 0xa44   :  { %v1377_v9 = vpop.eup %1376 }
 0xa45   :  { %v776_v11 = vadd.f32 1.0, %v1377_v9  ;;  %v1062_v9 = vld [vmem:[%s1823_s2 + $0x8] sm:$0xff] }
 0xa46   :  { %v1379_v10 = vpop.eup %1378 }
 0xa47   :  { %v777_v12 = vadd.f32 1.0, %v1379_v10  ;;  %v1381_v13 = vpop.eup %1380  ;;  %v1061_v10 = vld [vmem:[%s1823_s2] sm:$0xff] }
 0xa49   :  { %1382 = vrcp.f32 %v777_v12 }
 0xa4a   :  { %1384 = vrcp.f32 %v776_v11 }
 0xa56   :  { %v1383_v14 = vpop.eup %1382 }
 0xa57   :  { %v1385_v15 = vpop.eup %1384  ;;  %v783_v16 = vsel %vm23_vm0, %v1381_v13, %v1383_v14 }
 0xa58   :  { %v785_v42 = vmul.f32 %v1385_v15, %v783_v16  ;;  %v784_v43 = vmul.f32 %v1385_v15, %v663_v38 }
 0xa5a   :  { %787 = vrot.lane.b32.xlu0 %v785_v42, %s1413_s24  ;;  %v1056_v42 = vld [vmem:[#allocation2 + $0x18] sm:$0xff] }
 0xacc   :  { %v788_v44 = vpop.permute.xlu0 %787 }
 0xacd   :  { %v790_v45 = vadd.f32 %v788_v44, %v784_v43  ;;  %v1057_v43 = vld [vmem:[#allocation2 + $0x20] sm:$0xff] }
 0xacf   :  { %1386 = vtanh.f32 %v790_v45 }
 0xadc   :  { %v1387_v46 = vpop.eup %1386 }
 0xadd   :  { %v792_v47 = vmul.f32 %v1387_v46, %v783_v16 }
 0xadf   :  { %794 = vrot.lane.b32.xlu1 %v792_v47, %s1413_s24  ;;  %v1261_v47 = vld [vmem:[%s1824_s3] ss:$0 sm:$0xff] }
 0xb51   :  { %v795_v48 = vpop.permute.xlu1 %794 }
 0xb52   :  { %797 = vst.msk [vmem:[#allocation2 + $0x28] sm:$0xff] %vm153_vm1, %v795_v48  ;;  %1253 = vmatmul.mubr.msk.f32.vlgmr.msra.gmra.mxu0 %vm47_vm3, %v795_v48 }
 0xb53   :  { %798 = vst.msk [vmem:[#allocation2 + $0x10] sm:$0xff] %vm156_vm2, %v795_v48  ;;  %1287 = vmatpush3.msra.mxu0 %v1068_v1 }
 0xb54   :  { %1288 = vmatprep.subr.mxu0 %v1067_v2 }
 0xb55   :  { %1289 = vmatpush3.msra.mxu0 %v1067_v2 }
 0xb56   :  { %1290 = vmatprep.subr.mxu0 %v1066_v3 }
 0xb57   :  { %1291 = vmatpush3.msra.mxu0 %v1066_v3 }
 0xb58   :  { %1292 = vmatprep.subr.mxu0 %v1065_v31 }
 0xb59   :  { %1293 = vmatpush3.msra.mxu0 %v1065_v31  ;;  %v1058_v44 = vld [vmem:[#allocation2 + $0x28] sm:$0xff] }
 0xb5a   :  { %1294 = vmatprep.subr.mxu0 %v1064_v7  ;;  %v1055_v16 = vld [vmem:[#allocation2 + $0x10] sm:$0xff] }
 0xb5b   :  { %1295 = vmatpush3.msra.mxu0 %v1064_v7 }
 0xb5c   :  { %1296 = vmatprep.subr.mxu0 %v1063_v8 }
 0xb5d   :  { %1297 = vmatpush3.msra.mxu0 %v1063_v8 }
 0xb5e   :  { %1298 = vmatprep.subr.mxu0 %v1062_v9 }
 0xb5f   :  { %1299 = vmatpush3.msra.mxu0 %v1062_v9 }
 0xb60   :  { %1300 = vmatprep.subr.mxu0 %v1061_v10 }
 0xb61   :  { %1301 = vmatpush3.msra.mxu0 %v1061_v10 }
 0xc12   :  { %v888_v50 = vpop.f32.mrf.mxu0 }
 0xc13   :  { %v893_v52 = vadd.f32 %v1251_v49, %v888_v50 }
 0xc14   :  { %v890_v53 = vpop.f32.mrf.mxu0 }
 0xc15   :  { %v1254_v0 = vmul.f32 -1.442695, %v893_v52  ;;  %v894_v54 = vadd.f32 %v1252_v51, %v890_v53 }
 0xc17   :  { %1388 = vpow2.f32 %v1254_v0  ;;  %v1255_v55 = vmul.f32 -1.442695, %v894_v54 }
 0xc19   :  { %1390 = vpow2.f32 %v1255_v55 }
 0xc1a   :  { %1392 = vtanh.f32 %v894_v54 }
 0xc24   :  { %v1389_v56 = vpop.eup %1388 }
 0xc25   :  { %v903_v58 = vadd.f32 1.0, %v1389_v56 }
 0xc26   :  { %v1391_v57 = vpop.eup %1390 }
 0xc27   :  { %v904_v59 = vadd.f32 1.0, %v1391_v57  ;;  %v1393_v60 = vpop.eup %1392 }
 0xc29   :  { %1394 = vrcp.f32 %v904_v59 }
 0xc2a   :  { %1396 = vrcp.f32 %v903_v58 }
 0xc36   :  { %v1395_v61 = vpop.eup %1394 }
 0xc37   :  { %v1397_v62 = vpop.eup %1396  ;;  %v910_v63 = vsel %vm23_vm0, %v1393_v60, %v1395_v61 }
 0xc38   :  { %v912_v17 = vmul.f32 %v1397_v62, %v910_v63  ;;  %v911_v18 = vmul.f32 %v1397_v62, %v790_v45 }
 0xc3a   :  { %914 = vrot.lane.b32.xlu0 %v912_v17, %s1413_s24 }
 0xcac   :  { %v915_v19 = vpop.permute.xlu0 %914 }
 0xcad   :  { %v917_v20 = vadd.f32 %v915_v19, %v911_v18 }
 0xcaf   :  { %1398 = vtanh.f32 %v917_v20 }
 0xcbc   :  { %v1399_v21 = vpop.eup %1398 }
 0xcbd   :  { %v919_v22 = vmul.f32 %v1399_v21, %v910_v63 }
 0xcbf   :  { %921 = vrot.lane.b32.xlu1 %v919_v22, %s1413_s24 }
 0xd31   :  { %v922_v23 = vpop.permute.xlu1 %921 }
 0xd32   :  { %924 = vst.msk [vmem:[#allocation2 + $0x30] sm:$0xff] %vm153_vm1, %v922_v23  ;;  %1258 = vmatmul.mubr.msk.f32.vlgmr.msra.gmra.mxu1 %vm47_vm3, %v922_v23 }
 0xd33   :  { %925 = vst.msk [vmem:[#allocation2 + $0x8] sm:$0xff] %vm156_vm2, %v922_v23 }
 0xd39   :  { %v1059_v45 = vld [vmem:[#allocation2 + $0x30] sm:$0xff] }
 0xd3a   :  { %v1054_v15 = vld [vmem:[#allocation2 + $0x8] sm:$0xff] }
 0xdf2   :  { %v1015_v25 = vpop.f32.mrf.mxu1 }
 0xdf3   :  { %v1020_v27 = vadd.f32 %v1256_v24, %v1015_v25 }
 0xdf4   :  { %v1017_v28 = vpop.f32.mrf.mxu1 }
 0xdf5   :  { %v1259_v29 = vmul.f32 -1.442695, %v1020_v27  ;;  %v1021_v30 = vadd.f32 %v1257_v26, %v1017_v28 }
 0xdf7   :  { %1400 = vpow2.f32 %v1259_v29  ;;  %v1260_v32 = vmul.f32 -1.442695, %v1021_v30 }
 0xdf9   :  { %1402 = vpow2.f32 %v1260_v32 }
 0xdfa   :  { %1404 = vtanh.f32 %v1021_v30 }
 0xe04   :  { %v1401_v33 = vpop.eup %1400 }
 0xe05   :  { %v1030_v35 = vadd.f32 1.0, %v1401_v33 }
 0xe06   :  { %v1403_v34 = vpop.eup %1402 }
 0xe07   :  { %v1031_v36 = vadd.f32 1.0, %v1403_v34  ;;  %v1405_v37 = vpop.eup %1404 }
 0xe09   :  { %1406 = vrcp.f32 %v1031_v36 }
 0xe0a   :  { %1408 = vrcp.f32 %v1030_v35 }
 0xe16   :  { %v1407_v38 = vpop.eup %1406 }
 0xe17   :  { %v1409_v39 = vpop.eup %1408  ;;  %v1037_v40 = vsel %vm23_vm0, %v1405_v37, %v1407_v38 }
 0xe18   :  { %v1039_v41 = vmul.f32 %v1409_v39, %v1037_v40  ;;  %v1038_v4 = vmul.f32 %v1409_v39, %v917_v20 }
 0xe1a   :  { %1041 = vrot.lane.b32.xlu0 %v1039_v41, %s1413_s24 }
 0xe8c   :  { %v1042_v5 = vpop.permute.xlu0 %1041 }
 0xe8d   :  { %v1044_v6 = vadd.f32 %v1042_v5, %v1038_v4 }
 0xe8f   :  { %1410 = vtanh.f32 %v1044_v6 }
 0xe9c   :  { %v1411_v11 = vpop.eup %1410 }
 0xe9d   :  { %v1046_v12 = vmul.f32 %v1411_v11, %v1037_v40 }
 0xe9f   :  { %1048 = vrot.lane.b32.xlu1 %v1046_v12, %s1413_s24 }
 0xf11   :  { %v1049_v13 = vpop.permute.xlu1 %1048 }
 0xf12   :  { %1051 = vst.msk [vmem:[#allocation2 + $0x38] sm:$0xff] %vm153_vm1, %v1049_v13 }
 0xf13   :  { %1052 = vst.msk [vmem:[#allocation2] sm:$0xff] %vm156_vm2, %v1049_v13 }
 0xf19   :  { %v1060_v46 = vld [vmem:[#allocation2 + $0x38] sm:$0xff] }
 0xf1a   :  { %v1053_v14 = vld [vmem:[#allocation2] sm:$0xff] }
 0xf1b   :  { %1302 = vmatprep.mubr.msk.f32.mxu0 %vm47_vm3, %v1053_v14 }
 0xf1c   :  { %1303 = vmatmul.mubr.msk.f32.vlgmr.msra.gmra.mxu0 %vm47_vm3, %v1054_v15 }
 0xf1d   :  { %1305 = vmatprep.mubr.msk.f32.mxu0 %vm47_vm3, %v1055_v16 }
 0xf20   :  { %1306 = vmatmul.mubr.msk.f32.gmra.mxu0 %vm47_vm3, %v1056_v42 }
 0xf21   :  { %1308 = vmatprep.mubr.msk.f32.mxu0 %vm47_vm3, %v1057_v43 }
 0xf24   :  { %1309 = vmatmul.mubr.msk.f32.gmra.mxu0 %vm47_vm3, %v1058_v44 }
 0xf25   :  { %1311 = vmatprep.mubr.msk.f32.mxu0 %vm47_vm3, %v1059_v45 }
 0xf28   :  { %1312 = vmatmul.mubr.msk.f32.gmra.mxu0 %vm47_vm3, %v1060_v46 }
 0xfdc   :  { %v1304_v48 = vpop.f32.mrf.mxu0 }
 0xfdd   :  { %v1172_v49 = vadd.f32 %v1304_v48, %v1261_v47 }
 0xfde   :  { %v1166_v50 = vpop.f32.mrf.mxu0 }
 0xfdf   :  { %1206 = vst [vmem:[%s1825_s4 + $0x8] sm:$0xff] %v1172_v49  ;;  %v1167_v51 = vadd.f32 %v1261_v47, %v1166_v50 }
 0xfe0   :  { %v1307_v52 = vpop.f32.mrf.mxu0 }
 0xfe1   :  { %1205 = vst [vmem:[%s1825_s4] sm:$0xff] %v1167_v51  ;;  %v1182_v53 = vadd.f32 %v1307_v52, %v1261_v47 }
 0xfe2   :  { %v1176_v0 = vpop.f32.mrf.mxu0 }
 0xfe3   :  { %1208 = vst [vmem:[%s1825_s4 + $0x18] sm:$0xff] %v1182_v53  ;;  %v1177_v54 = vadd.f32 %v1261_v47, %v1176_v0 }
 0xfe4   :  { %v1310_v55 = vpop.f32.mrf.mxu0 }
 0xfe5   :  { %1207 = vst [vmem:[%s1825_s4 + $0x10] sm:$0xff] %v1177_v54  ;;  %v1192_v56 = vadd.f32 %v1310_v55, %v1261_v47 }
 0xfe6   :  { %v1186_v57 = vpop.f32.mrf.mxu0 }
 0xfe7   :  { %1210 = vst [vmem:[%s1825_s4 + $0x28] sm:$0xff] %v1192_v56  ;;  %v1187_v58 = vadd.f32 %v1261_v47, %v1186_v57 }
 0xfe8   :  { %v1313_v59 = vpop.f32.mrf.mxu0 }
 0xfe9   :  { %1209 = vst [vmem:[%s1825_s4 + $0x20] sm:$0xff] %v1187_v58  ;;  %v1202_v60 = vadd.f32 %v1313_v59, %v1261_v47 }
 0xfea   :  { %v1196_v61 = vpop.f32.mrf.mxu0 }
 0xfeb   :  { %1212 = vst [vmem:[%s1825_s4 + $0x38] sm:$0xff] %v1202_v60  ;;  %v1197_v62 = vadd.f32 %v1261_v47, %v1196_v61 }
 0xfed   :  { %1211 = vst [vmem:[%s1825_s4 + $0x30] sm:$0xff] %v1197_v62 }

</bundles_post_ra>
